<compile_context>
chip_gen: v5e
topology: v5e:2x2
jax: 0.10.0
libtpu: 0.0.40
codegen_flags: <defaults>
</compile_context>

<pallas_src>
import jax
import jax.numpy as jnp
from jax import lax
from jax.experimental import pallas as pl
from jax.experimental.pallas import tpu as pltpu


def nn_classifier_kernel(x_ref, w1_ref, b1_ref, wp_ref, bp_ref, o_ref):
    # x_ref : (TILE_B, F)   batch-major block (one contiguous HBM run)
    # w1_ref: (2H, F)       b1_ref: (2H, 1)
    # wp_ref: (O, 2H)       bp_ref: (O, 1)
    # o_ref : (O, TILE_B)   lane-dense output tile (batch on the 128-lane axis)
    x = x_ref[...]

    # hidden = relu(W1 @ x^T + b1)  -> (2H, TILE_B), feature-major.
    # Contract the last dims of both operands (q @ k^T pattern) so no
    # transpose of the big x block is ever materialized.
    h = lax.dot_general(
        w1_ref[...], x,
        dimension_numbers=(((1,), (1,)), ((), ())),
        preferred_element_type=jnp.float32)
    h = jnp.maximum(h + b1_ref[...], 0.0)

    # logits = Wp @ hidden + bp  -> (O, TILE_B)
    out = jnp.dot(wp_ref[...], h, preferred_element_type=jnp.float32)
    o_ref[...] = (out + bp_ref[...]).astype(o_ref.dtype)


def _choose_tile_b(B, max_tile_b):
    """Pick the batch tile.

    Either the full batch (always a legal block shape) for small B, or a
    multiple of 128 capped at max_tile_b, aiming for >= ~4 grid steps so
    v7x's two TensorCores each see >= 2 pipelined steps (harmless on
    v5e/v6e, which have a single TensorCore)."""
    if B <= 512:
        return B
    tb = pl.cdiv(pl.cdiv(B, 4), 128) * 128
    return int(min(max_tile_b, tb))


def nn_classifier_forward(x, params, tile_b=8192):
    """x: (B, input_dim) float32. Returns (B, output_dim) float32."""
    B, F = x.shape
    H2 = params["w1"].shape[0]          # 2 * hidden_dim
    O = params["wp"].shape[0]           # output_dim
    assert tile_b % 128 == 0, "tile_b must be a multiple of 128"

    tb = _choose_tile_b(B, tile_b)
    grid = (pl.cdiv(B, tb),)            # partial final block is allowed

    out_T = pl.pallas_call(
        nn_classifier_kernel,
        out_shape=jax.ShapeDtypeStruct((O, B), jnp.float32),
        grid=grid,
        in_specs=[
            pl.BlockSpec((tb, F), lambda i: (i, 0)),    # x    : tiled over batch
            pl.BlockSpec((H2, F), lambda i: (0, 0)),    # W1   : resident full block
            pl.BlockSpec((H2, 1), lambda i: (0, 0)),    # b1
            pl.BlockSpec((O, H2), lambda i: (0, 0)),    # Wp
            pl.BlockSpec((O, 1), lambda i: (0, 0)),     # bp
        ],
        out_specs=pl.BlockSpec((O, tb), lambda i: (0, i)),
        compiler_params=pltpu.CompilerParams(
            dimension_semantics=("parallel",),          # megacore split on v7x
            vmem_limit_bytes=32 * 1024 * 1024,          # safe on v5e/v6e/v7x
        ),
    )(x, params["w1"], params["b1"], params["wp"], params["bp"])

    # Tiny (O, B) -> (B, O) layout fixup to match the PyTorch forward; drop it
    # if the consumer (argmax/softmax over classes) can use feature-major logits.
    return jnp.transpose(out_T)


def init_params(key, input_dim, hidden_dim, output_dim):
    """PyTorch-style Linear init: U(-1/sqrt(fan_in), +1/sqrt(fan_in)).
    Weights kept in PyTorch layout (out_features, in_features); biases (out, 1)."""
    h2 = 2 * hidden_dim
    ks = jax.random.split(key, 4)

    def lin(kw, kb, fan_in, fan_out):
        bound = 1.0 / jnp.sqrt(jnp.float32(fan_in))
        w = jax.random.uniform(kw, (fan_out, fan_in), jnp.float32, -bound, bound)
        b = jax.random.uniform(kb, (fan_out, 1), jnp.float32, -bound, bound)
        return w, b

    w1, b1 = lin(ks[0], ks[1], input_dim, h2)
    wp, bp = lin(ks[2], ks[3], h2, output_dim)
    return {"w1": w1, "b1": b1, "wp": wp, "bp": bp}


if __name__ == "__main__":
    input_dim, hidden_dim, output_dim = 10, 10, 3   # module defaults
    B = 1000   # not a multiple of 128 -> exercises multi-step grid + masked tail

    key = jax.random.PRNGKey(0)
    kx, kp = jax.random.split(key)
    x = jax.random.normal(kx, (B, input_dim), jnp.float32)
    params = init_params(kp, input_dim, hidden_dim, output_dim)

    out = nn_classifier_forward(x, params)
    jax.block_until_ready(out)

    # Pure-JAX reference of the PyTorch forward.
    ref = jnp.maximum(x @ params["w1"].T + params["b1"].T, 0.0)
    ref = ref @ params["wp"].T + params["bp"].T

    assert out.shape == (B, output_dim)
    assert jnp.allclose(out, ref, atol=1e-4, rtol=1e-4)
    print("KERNEL_OK")
</pallas_src>

<mosaic_0001>
module attributes {stable_mosaic.version = 11 : i64} {
  func.func @nn_classifier_kernel(%arg0: i32, %arg1: memref<256x10xf32, #tpu.memory_space<vmem>>, %arg2: memref<20x10xf32, #tpu.memory_space<vmem>>, %arg3: memref<20x1xf32, #tpu.memory_space<vmem>>, %arg4: memref<3x20xf32, #tpu.memory_space<vmem>>, %arg5: memref<3x1xf32, #tpu.memory_space<vmem>>, %arg6: memref<3x256xf32, #tpu.memory_space<vmem>>) attributes {dimension_semantics = [#tpu.dimension_semantics<parallel>], iteration_bounds = array<i64: 4>, scalar_prefetch = 0 : i64, scratch_operands = 0 : i64, tpu.core_type = #tpu.core_type<tc>, window_params = [{transform_indices = @transform_0, window_bounds = array<i64: 256, 10>}, {pipeline_mode = #tpu.pipeline_mode<synchronous>, transform_indices = @transform_1, window_bounds = array<i64: 20, 10>}, {pipeline_mode = #tpu.pipeline_mode<synchronous>, transform_indices = @transform_2, window_bounds = array<i64: 20, 1>}, {pipeline_mode = #tpu.pipeline_mode<synchronous>, transform_indices = @transform_3, window_bounds = array<i64: 3, 20>}, {pipeline_mode = #tpu.pipeline_mode<synchronous>, transform_indices = @transform_4, window_bounds = array<i64: 3, 1>}, {transform_indices = @transform_5, window_bounds = array<i64: 3, 256>}]} {
    %c0 = arith.constant 0 : index
    %c0_0 = arith.constant 0 : index
    %0 = vector.load %arg1[%c0, %c0_0] : memref<256x10xf32, #tpu.memory_space<vmem>>, vector<256x10xf32>
    %c0_1 = arith.constant 0 : index
    %c0_2 = arith.constant 0 : index
    %1 = vector.load %arg2[%c0_1, %c0_2] : memref<20x10xf32, #tpu.memory_space<vmem>>, vector<20x10xf32>
    %cst = arith.constant dense<0.000000e+00> : vector<20x256xf32>
    %2 = tpu.matmul %1, %0, %cst {dimension_numbers = #tpu.dot_dimension_numbers<[1], [1], [0], [0], [0, 0, 1, 0], [], []>} : vector<20x10xf32>, vector<256x10xf32>, vector<20x256xf32> -> vector<20x256xf32>
    %c0_3 = arith.constant 0 : index
    %c0_4 = arith.constant 0 : index
    %3 = vector.load %arg3[%c0_3, %c0_4] : memref<20x1xf32, #tpu.memory_space<vmem>>, vector<20x1xf32>
    %4 = vector.broadcast %3 : vector<20x1xf32> to vector<20x256xf32>
    %5 = arith.addf %2, %4 : vector<20x256xf32>
    %cst_5 = arith.constant 0.000000e+00 : f32
    %6 = vector.broadcast %cst_5 : f32 to vector<20x256xf32>
    %7 = arith.maximumf %5, %6 : vector<20x256xf32>
    %c0_6 = arith.constant 0 : index
    %c0_7 = arith.constant 0 : index
    %8 = vector.load %arg4[%c0_6, %c0_7] : memref<3x20xf32, #tpu.memory_space<vmem>>, vector<3x20xf32>
    %cst_8 = arith.constant dense<0.000000e+00> : vector<3x256xf32>
    %9 = tpu.matmul %8, %7, %cst_8 {dimension_numbers = #tpu.dot_dimension_numbers<[1], [0], [0], [1], [0, 0, 1, 1], [], []>} : vector<3x20xf32>, vector<20x256xf32>, vector<3x256xf32> -> vector<3x256xf32>
    %c0_9 = arith.constant 0 : index
    %c0_10 = arith.constant 0 : index
    %10 = vector.load %arg5[%c0_9, %c0_10] : memref<3x1xf32, #tpu.memory_space<vmem>>, vector<3x1xf32>
    %11 = vector.broadcast %10 : vector<3x1xf32> to vector<3x256xf32>
    %12 = arith.addf %9, %11 : vector<3x256xf32>
    %c0_11 = arith.constant 0 : index
    %c0_12 = arith.constant 0 : index
    %13 = vector.load %arg6[%c0_11, %c0_12] : memref<3x256xf32, #tpu.memory_space<vmem>>, vector<3x256xf32>
    tpu.vector_store %arg6[%c0_11, %c0_12], %12 {strides = array<i32>} : memref<3x256xf32, #tpu.memory_space<vmem>>, vector<3x256xf32>,
    return
  }
  func.func @transform_0(%arg0: i32) -> (i32, i32) {
    %c0_i32 = arith.constant 0 : i32
    %c0_i32_0 = arith.constant 0 : i32
    return %arg0, %c0_i32 : i32, i32
  }
  func.func @transform_1(%arg0: i32) -> (i32, i32) {
    %c0_i32 = arith.constant 0 : i32
    %c0_i32_0 = arith.constant 0 : i32
    %c0_i32_1 = arith.constant 0 : i32
    return %c0_i32, %c0_i32_0 : i32, i32
  }
  func.func @transform_2(%arg0: i32) -> (i32, i32) {
    %c0_i32 = arith.constant 0 : i32
    %c0_i32_0 = arith.constant 0 : i32
    %c0_i32_1 = arith.constant 0 : i32
    return %c0_i32, %c0_i32_0 : i32, i32
  }
  func.func @transform_3(%arg0: i32) -> (i32, i32) {
    %c0_i32 = arith.constant 0 : i32
    %c0_i32_0 = arith.constant 0 : i32
    %c0_i32_1 = arith.constant 0 : i32
    return %c0_i32, %c0_i32_0 : i32, i32
  }
  func.func @transform_4(%arg0: i32) -> (i32, i32) {
    %c0_i32 = arith.constant 0 : i32
    %c0_i32_0 = arith.constant 0 : i32
    %c0_i32_1 = arith.constant 0 : i32
    return %c0_i32, %c0_i32_0 : i32, i32
  }
  func.func @transform_5(%arg0: i32) -> (i32, i32) {
    %c0_i32 = arith.constant 0 : i32
    %c0_i32_0 = arith.constant 0 : i32
    return %c0_i32, %arg0 : i32, i32
  }
}

</mosaic_0001>

<bundles_post_ra>
// kernel: tpu_custom_call.1
= control target key start
LH: loop header
LB: loop body
LE: loop exit
PB: predicated region body
PF: predicated region fallthrough
CT: control target
= control target key end

     0   :  { %10 = vsyncpa [#allocation3], 0  ;;  %s978_s0 = inlined_call_operand.vmem [shape: f32[1000,10], index: 0, kind: input, shape index: {}]   ;;  %s979_s1 = inlined_call_operand.vmem [shape: f32[20,10], index: 1, kind: input, shape index: {}]   ;;  %s980_s2 = inlined_call_operand.vmem [shape: f32[20,1], index: 2, kind: input, shape index: {}]   ;;  %s981_s3 = inlined_call_operand.vmem [shape: f32[3,20], index: 3, kind: input, shape index: {}]   ;;  %s982_s4 = inlined_call_operand.vmem [shape: f32[3,1], index: 4, kind: input, shape index: {}]   ;;  %s983_s5 = inlined_call_operand.hbm [shape: f32[3,1000], index: 5, kind: output, shape index: {}]  }
   0x1   :  { %12 = vsyncpa [#allocation3 + $0x1], 0  ;;  %s795_s18 = smov 0   ;;  %s797_s19 = smov 0  }
   0x2   :  { %s799_s20 = smov 0   ;;  %s801_s21 = smov 0  }
   0x3 LB: > { %s816_s22 = sadd.s32 4294967295, %s762_s21   ;;  %s603_s23 = sadd.s32 4294967294, %s762_s21   ;;  %s762_s21 = sphi %s801_s21, %s989_s21   ;;  %s758_s20 = sphi %s799_s20, %s988_s20   ;;  %s754_s19 = sphi %s797_s19, %s987_s19   ;;  %s750_s18 = sphi %s795_s18, %s986_s18  }
   0x4   : > { %s820_s24 = sadd.s32 1, %s762_s21   ;;  %s135_s25 = sadd.s32 1, %s758_s20 }
   0x5   : > { %s132_s26 = ssub.s32 %s762_s21, %s820_s24  ;;  %p145_p0 = scmp.ne.s32.totalorder %s758_s20, %s754_s19 }
   0x6   : > { %p133_p1 = scmp.eq.s32.totalorder %s132_s26, 0  ;;  %p146_p2 = scmp.eq.s32.totalorder %s816_s22, 3 }
   0x7   : > { %p151_p3 = scmp.ne.s32.totalorder %s754_s19, %s750_s18  ;;  %p152_p4 = scmp.eq.s32.totalorder %s603_s23, 3 }
   0x8   : > { %s831_s27 = scalar_select %p133_p1, %s758_s20, %s135_s25  }
   0x9   : > { %p833_p5 = por %p146_p2, %p145_p0  ;;  %p837_p6 = por %p152_p4, %p151_p3 }
   0xa   : > { %p606_p7 = scmp.ge.s32.totalorder %s762_s21, 1  ;;  %p199_p8 = scmp.lt.s32.totalorder %s762_s21, 5 }
   0xc   : > { %p200_p9 = pnand %p606_p7, %p199_p8 }
   0xd   : > { %s608_s30 = sshll.u32 (!%p200_p9), %s816_s22, 5  ;;  %s228_s10 = sand.u32 (!%p200_p9), 1, %s754_s19  }
   0xe   : > { %203 = sbr.rel (%p200_p9) target bundleno = 378 (0x17a), region = 40  ;;  %p236_p10 = scmp.lt.s32.totalorder (!%p200_p9), %s608_s30, 124 }
   0xf   : > { %s607_s11 = sshll.u32 (!%p200_p9), %s228_s10, 3  ;;  %s657_s12 = sshll.u32 (!%p200_p9), %s816_s22, 3 }
  0x10   : > { %s539_s15 = scalar_lea.hbm (!%p200_p9), %s983_s5, %s657_s12  ;;  %s230_s16 = scalar_lea.vmem (!%p200_p9), [#allocation2], %s607_s11 }
  0x11   : > { %s541_s17 = sshll.u32 (!%p200_p9), %s230_s16, 4  ;;  %s543_s23 = sshll.u32 (!%p200_p9), %s539_s15, 4  ;;  %s542_s17 = int_to_ptr.vmem [resolvable:$true] %s541_s17  ;;  %s544_s23 = int_to_ptr.hbm [resolvable:$true] %s543_s23 }
  0x12   : > { %s528_s22 = scalar_lea.sflag (!%p200_p9), [#allocation3], %s228_s10  ;;  %s714_s25 = sshra.s32 (!%p200_p9), %s544_s23, 4  ;;  %s715_s25 = int_to_ptr.hbm [resolvable:$true] %s714_s25 }
  0x13   : > { %s991_s30 = smov (!%p236_p10, %s608_s30), 124  ;;  %vm299_vm0 = vcmask 80896   ;;  %v283_v22 = vld [vmem:[%s980_s2 + $0x10] sm:$0xf]  ;;  %v281_v23 = vld [vmem:[%s980_s2] sm:$0xff]  ;;  %v764_v26 = vmov 0   ;;  %p721_p0 = scmp.lt.s32.totalorder %s715_s25, %s983_s5 }
  0x14   : > { %s609_s6 = sshll.u32 %s991_s30, 3  ;;  %699 = vset.pattern.permute.xlu1 %v764_v26  ;;  %698 = vset.pattern.permute.xlu0 %v764_v26  ;;  %v282_v29 = vld [vmem:[%s980_s2 + $0x8] sm:$0xff]  ;;  %v464_v30 = vld [vmem:[%s982_s4] sm:$0x7]  ;;  %v280_v39 = vld [vmem:[%s979_s1 + $0x10] sm:$0xf] }
  0x15   : > { %s847_s9 = scalar_lea.vmem %s978_s0, %s609_s6  ;;  %296 = vperm.xlu0 %698, %v283_v22   ;;  %286 = vperm.xlu1 %699, %v281_v23   ;;  %v278_v37 = vld [vmem:[%s979_s1] sm:$0xff]  ;;  %v279_v38 = vld [vmem:[%s979_s1 + $0x8] sm:$0xff]  ;;  %vm474_vm1 = vcmask 1043456   ;;  %vm470_vm2 = vcmask 162816   ;;  %s716_s26 = scalar_lea.hbm %s715_s25, 8 }
  0x16   : > { %v261_v0 = vld [vmem:[%s847_s9 + $0x78] sm:$0xff]  ;;  %v260_v2 = vld [vmem:[%s847_s9 + $0x70] sm:$0xff]  ;;  %v259_v4 = vld [vmem:[%s847_s9 + $0x68] sm:$0xff]  ;;  %p717_p11 = scmp.ne.s32.totalorder %s715_s25, %s716_s26  ;;  %s720_s7 = scalar_lea.hbm %s983_s5, 32 }
  0x17   : > { %v277_v1 = vld [vmem:[%s847_s9 + $0xf8] sm:$0xff]  ;;  %610 = vmatpush.xpose.msk.msra.mxu0 %vm299_vm0, %v261_v0  ;;  %v276_v3 = vld [vmem:[%s847_s9 + $0xf0] sm:$0xff]  ;;  %v275_v5 = vld [vmem:[%s847_s9 + $0xe8] sm:$0xff]  ;;  %p722_p1 = scmp.lt.s32.totalorder %s720_s7, %s716_s26 }
  0x18   : > { %629 = vmatpush.xpose.msk.msra.mxu1 %vm299_vm0, %v277_v1  ;;  %v258_v6 = vld [vmem:[%s847_s9 + $0x60] sm:$0xff]  ;;  %v257_v8 = vld [vmem:[%s847_s9 + $0x58] sm:$0xff]  ;;  %v256_v10 = vld [vmem:[%s847_s9 + $0x50] sm:$0xff]  ;;  %p718_p12 = pnand %p717_p11, %p833_p5 }
  0x19   : > { %v274_v7 = vld [vmem:[%s847_s9 + $0xe0] sm:$0xff]  ;;  %v273_v9 = vld [vmem:[%s847_s9 + $0xd8] sm:$0xff]  ;;  %v272_v11 = vld [vmem:[%s847_s9 + $0xd0] sm:$0xff]  ;;  %p723_p2 = por %p722_p1, %p721_p0 }
  0x1a   : > { %v255_v12 = vld [vmem:[%s847_s9 + $0x48] sm:$0xff]  ;;  %v254_v14 = vld [vmem:[%s847_s9 + $0x40] sm:$0xff]  ;;  %v253_v16 = vld [vmem:[%s847_s9 + $0x38] sm:$0xff]  ;;  %p719_p13 = pneg %p718_p12 }
  0x1b   : > { %611 = vmatpush.xpose.msk.msra.mxu0 %vm299_vm0, %v260_v2  ;;  %v271_v13 = vld [vmem:[%s847_s9 + $0xc8] sm:$0xff]  ;;  %v270_v15 = vld [vmem:[%s847_s9 + $0xc0] sm:$0xff]  ;;  %v269_v17 = vld [vmem:[%s847_s9 + $0xb8] sm:$0xff] }
  0x1c   : > { %630 = vmatpush.xpose.msk.msra.mxu1 %vm299_vm0, %v276_v3  ;;  %v252_v18 = vld [vmem:[%s847_s9 + $0x30] sm:$0xff]  ;;  %v251_v20 = vld [vmem:[%s847_s9 + $0x28] sm:$0xff]  ;;  %v250_v24 = vld [vmem:[%s847_s9 + $0x20] sm:$0xff]  ;;  %p724_p3 = pnand %p723_p2, %p719_p13 }
  0x1d   : > { %v268_v19 = vld [vmem:[%s847_s9 + $0xb0] sm:$0xff]  ;;  %v267_v21 = vld [vmem:[%s847_s9 + $0xa8] sm:$0xff]  ;;  %v266_v25 = vld [vmem:[%s847_s9 + $0xa0] sm:$0xff]  ;;  %291 = vperm.xlu0 %698, %v282_v29   ;;  %467 = vperm.xlu1 %699, %v464_v30  }
  0x1e   : > { %v249_v27 = vld [vmem:[%s847_s9 + $0x18] sm:$0xff]  ;;  %v248_v31 = vld [vmem:[%s847_s9 + $0x10] sm:$0xff]  ;;  %v247_v33 = vld [vmem:[%s847_s9 + $0x8] sm:$0xff] }
  0x1f   : > { %612 = vmatpush.xpose.msk.msra.mxu0 %vm299_vm0, %v259_v4  ;;  %v265_v28 = vld [vmem:[%s847_s9 + $0x98] sm:$0xff]  ;;  %v264_v32 = vld [vmem:[%s847_s9 + $0x90] sm:$0xff]  ;;  %v263_v34 = vld [vmem:[%s847_s9 + $0x88] sm:$0xff] }
  0x20   : > { %631 = vmatpush.xpose.msk.msra.mxu1 %vm299_vm0, %v275_v5  ;;  %v246_v35 = vld [vmem:[%s847_s9] sm:$0xff] }
  0x21   : > { %v262_v36 = vld [vmem:[%s847_s9 + $0x80] sm:$0xff] }
  0x22   : > { %v463_v61 = vld [vmem:[%s981_s3] sm:$0x7] }
  0x23   : > { %613 = vmatpush.xpose.msk.msra.mxu0 %vm299_vm0, %v258_v6 }
  0x24   : > { %632 = vmatpush.xpose.msk.msra.mxu1 %vm299_vm0, %v274_v7 }
  0x27   : > { %614 = vmatpush.xpose.msk.msra.mxu0 %vm299_vm0, %v257_v8 }
  0x28   : > { %633 = vmatpush.xpose.msk.msra.mxu1 %vm299_vm0, %v273_v9 }
  0x2b   : > { %615 = vmatpush.xpose.msk.msra.mxu0 %vm299_vm0, %v256_v10 }
  0x2c   : > { %634 = vmatpush.xpose.msk.msra.mxu1 %vm299_vm0, %v272_v11 }
  0x2f   : > { %616 = vmatpush.xpose.msk.msra.mxu0 %vm299_vm0, %v255_v12 }
  0x30   : > { %635 = vmatpush.xpose.msk.msra.mxu1 %vm299_vm0, %v271_v13 }
  0x33   : > { %617 = vmatpush.xpose.msk.msra.mxu0 %vm299_vm0, %v254_v14 }
  0x34   : > { %636 = vmatpush.xpose.msk.msra.mxu1 %vm299_vm0, %v270_v15 }
  0x37   : > { %618 = vmatpush.xpose.msk.msra.mxu0 %vm299_vm0, %v253_v16 }
  0x38   : > { %637 = vmatpush.xpose.msk.msra.mxu1 %vm299_vm0, %v269_v17 }
  0x3b   : > { %619 = vmatpush.xpose.msk.msra.mxu0 %vm299_vm0, %v252_v18 }
  0x3c   : > { %638 = vmatpush.xpose.msk.msra.mxu1 %vm299_vm0, %v268_v19 }
  0x3f   : > { %620 = vmatpush.xpose.msk.msra.mxu0 %vm299_vm0, %v251_v20 }
  0x40   : > { %639 = vmatpush.xpose.msk.msra.mxu1 %vm299_vm0, %v267_v21 }
  0x43   : > { %621 = vmatpush.xpose.msk.msra.mxu0 %vm299_vm0, %v250_v24 }
  0x44   : > { %640 = vmatpush.xpose.msk.msra.mxu1 %vm299_vm0, %v266_v25 }
  0x47   : > { %622 = vmatpush.xpose.msk.msra.mxu0 %vm299_vm0, %v249_v27 }
  0x48   : > { %641 = vmatpush.xpose.msk.msra.mxu1 %vm299_vm0, %v265_v28 }
  0x4b   : > { %623 = vmatpush.xpose.msk.msra.mxu0 %vm299_vm0, %v248_v31 }
  0x4c   : > { %642 = vmatpush.xpose.msk.msra.mxu1 %vm299_vm0, %v264_v32 }
  0x4f   : > { %624 = vmatpush.xpose.msk.msra.mxu0 %vm299_vm0, %v247_v33 }
  0x50   : > { %643 = vmatpush.xpose.msk.msra.mxu1 %vm299_vm0, %v263_v34 }
  0x53   : > { %625 = vmatpush.xpose.msk.msra.mxu0 %vm299_vm0, %v246_v35 }
  0x54   : > { %644 = vmatpush.xpose.msk.msra.mxu1 %vm299_vm0, %v262_v36 }
  0x56   : > { %626 = vmatmul.msk.f32.vlgmr.msra.gmra.mxu0 %vm299_vm0, %v278_v37 }
  0x57   : > { %645 = vmatmul.msk.f32.vlgmr.msra.gmra.mxu1 %vm299_vm0, %v278_v37 }
  0x5e   : > { %627 = vmatmul.msk.f32.gmra.mxu0 %vm299_vm0, %v279_v38 }
  0x5f   : > { %646 = vmatmul.msk.f32.gmra.mxu1 %vm299_vm0, %v279_v38 }
  0x66   : > { %628 = vmatmul.msk.f32.gmra.mxu0 %vm299_vm0, %v280_v39 }
  0x67   : > { %647 = vmatmul.msk.f32.gmra.mxu1 %vm299_vm0, %v280_v39 }
  0x87   : > { %v297_v42 = vpop.permute.xlu0 %296  ;;  %v287_v46 = vpop.permute.xlu1 %286 }
  0x8f   : > { %v292_v45 = vpop.permute.xlu0 %291  ;;  %v468_v62 = vpop.permute.xlu1 %467 }
  0xd3   : > { %v422_v40 = vpop.f32.mrf.mxu0 }
  0xd4   : > { %v448_v41 = vpop.f32.mrf.mxu1  ;;  %v423_v53 = vadd.f32 %v422_v40, %v287_v46 }
  0xd5   : > { %v449_v54 = vadd.f32 %v448_v41, %v287_v46 }
  0xd6   : > { %v457_v59 = vmax.f32 %v423_v53, 0.0 }
  0xd7   : > { %v458_v60 = vmax.f32 %v449_v54, 0.0 }
  0xdb   : > { %v425_v43 = vpop.f32.mrf.mxu0 }
  0xdc   : > { %v451_v44 = vpop.f32.mrf.mxu1  ;;  %v426_v49 = vadd.f32 %v425_v43, %v292_v45 }
  0xdd   : > { %v452_v50 = vadd.f32 %v451_v44, %v292_v45 }
  0xde   : > { %v459_v57 = vmax.f32 %v426_v49, 0.0 }
  0xdf   : > { %v460_v58 = vmax.f32 %v452_v50, 0.0 }
  0xe3   : > { %v428_v47 = vpop.f32.mrf.mxu0 }
  0xe4   : > { %v454_v48 = vpop.f32.mrf.mxu1  ;;  %v429_v51 = vadd.f32 %v428_v47, %v297_v42 }
  0xe5   : > { %v455_v52 = vadd.f32 %v454_v48, %v297_v42 }
  0xe6   : > { %v461_v55 = vmax.f32 %v429_v51, 0.0 }
  0xe7   : > { %v462_v56 = vmax.f32 %v455_v52, 0.0 }
  0xe8   : > { %648 = vmatpush.msk.msra.mxu2 %vm474_vm1, %v461_v55 }
  0xe9   : > { %650 = vmatpush.msk.msra.mxu3 %vm474_vm1, %v462_v56 }
  0xea   : > { %495 = vmatpush.msra.mxu2 %v459_v57 }
  0xeb   : > { %515 = vmatpush.msra.mxu3 %v460_v58 }
  0xec   : > { %496 = vmatpush.msra.mxu2 %v457_v59 }
  0xed   : > { %516 = vmatpush.msra.mxu3 %v458_v60  ;;  %649 = vmatmul.msk.f32.vlgmr.msra.gmra.mxu2 %vm470_vm2, %v463_v61 }
  0xee   : > { %651 = vmatmul.msk.f32.vlgmr.msra.gmra.mxu3 %vm470_vm2, %v463_v61 }
 0x170   : > { %v498_v63 = vpop.f32.mrf.mxu2 }
 0x171   : > { %v518_v0 = vpop.f32.mrf.mxu3  ;;  %v499_v2 = vadd.f32 %v498_v63, %v468_v62 }
 0x172   : > { %v519_v1 = vadd.f32 %v518_v0, %v468_v62 }
 0x174   : > { %v523_v3 = vrot.slane %v519_v1, 4 }
 0x176   : > { %v524_v4 = vsel %vm474_vm1, %v499_v2, %v523_v3 }
 0x177   : > { %526 = vst [vmem:[%s230_s16] sm:$0x77] %v524_v4 }
 0x178   : > { %727 = shalt.err (!%p724_p3)
}
 0x179   : > { %658 = dma.vmem_to_hbm [thread:$0]  (%p833_p5), %s542_s17, 128, %s544_s23, %s528_s22  }
 0x17a PF: > { %p664_p4 = scmp.ge.s32.totalorder %s762_s21, 2  ;;  %s555_s10 = sand.u32 1, %s750_s18  }
 0x17b   : > { %s556_s11 = scalar_lea.sflag [#allocation3], %s555_s10 }
 0x17c   : > { %p661_p7 = pnand %p664_p4, %p837_p6 }
 0x17e   : > { %p662_p8 = pneg %p661_p7 }
 0x180   : > { %745 = dma.done.wait (%p662_p8), %s556_s11, 128  }
 0x181   : > { %747 = vsyncadd (%p662_p8), %s556_s11, 4294967168  ;;  %p15_p9 = scmp.ge.s32.totalorder %s820_s24, 6   ;;  %s986_s18 = smov %s754_s19 }
 0x182   : > { %s987_s19 = smov %s758_s20  ;;  %s988_s20 = smov %s831_s27 }
 0x183   : > { %s989_s21 = smov %s820_s24  ;;  %17 = sbr.rel (!%p15_p9) target bundleno = 3 (0x3), region = 75 }
 0x188   :  { %562 = vsyncpa [#allocation3], 1 }
 0x189   :  { %564 = vsyncpa [#allocation3 + $0x1], 1 }

</bundles_post_ra>
